<compile_context>
chip_gen: v5e
topology: v5e:2x2
jax: 0.10.0
libtpu: 0.0.40
codegen_flags: <defaults>
</compile_context>

<pallas_src>
import functools

import jax
import jax.numpy as jnp
from jax.experimental import pallas as pl
from jax.experimental.pallas import tpu as pltpu


def _head_kernel(x_ref, w_ref, b_ref, hmap_ref, wh_ref, *, num_classes):
    # x_ref:    (C, tile_hw)        pixels-in-lanes tile of one batch element
    # w_ref:    (n_pad, C)          fused 1x1-conv weights [hmap | w_h_ | reg_ | 0-pad]
    # b_ref:    (n_pad, 1)          fused biases (0 in the padded rows)
    # hmap_ref: (num_classes, tile) heatmap logits
    # wh_ref:   (4, tile)           [exp(w_h_) ; reg_]
    x = x_ref[...]
    w = w_ref[...]
    b = b_ref[...]
    # Single wide dot drives the MXU; f32 accumulate.
    out = jnp.dot(w, x, preferred_element_type=jnp.float32) + b  # (n_pad, tile)

    nc = num_classes
    hmap_ref[...] = out[:nc].astype(hmap_ref.dtype)
    # exp only on the two w_h_ rows (static sublane slices, no masks/iota).
    wh_ref[0:2, :] = jnp.exp(out[nc:nc + 2]).astype(wh_ref.dtype)
    wh_ref[2:4, :] = out[nc + 2:nc + 4].astype(wh_ref.dtype)


def _pick_tile_hw(hw, bytes_per_pixel, max_tile_bytes, n_batch):
    """Lane-tile size: multiple of 128 (or full HW), within the byte budget,
    with a guard so the total grid has >= 2 steps for megacore balance."""
    if hw <= 512:
        tile = hw
    else:
        budget_lanes = max(128, (max_tile_bytes // max(1, bytes_per_pixel)) // 128 * 128)
        hw_floor128 = (hw // 128) * 128          # >= 512 here
        tile = min(budget_lanes, hw_floor128)
    # Megacore balance (v7x has 2 TensorCores): avoid a (1, 1) grid when we can
    # cleanly halve the tile and stay a multiple of 128.
    while n_batch * pl.cdiv(hw, tile) < 2 and tile > 128 and tile % 256 == 0:
        tile //= 2
    return tile


def prediction_module_forward(x_nchw, w_hmap, b_hmap, w_wh, b_wh, w_reg, b_reg,
                              *, num_classes=1, max_tile_bytes=8 << 20):
    """Forward pass of PredictionModule.

    x_nchw: (N, C, H, W) float32
    w_*:    (out_ch, C, 1, 1) conv weights (PyTorch layout)
    b_*:    (out_ch,) biases
    Returns {'hmap': (N, num_classes, H, W), 'wh': (N, 4, H, W)}.
    """
    N, C, H, W = x_nchw.shape
    HW = H * W
    nc = num_classes
    n_out = nc + 4
    n_pad = max(8, ((n_out + 7) // 8) * 8)   # pad rows to a sublane multiple

    # (N, C, H, W) -> (N, C, HW): pure reshape, no transpose.
    x_flat = x_nchw.reshape(N, C, HW)

    # Fused 1x1-conv weight/bias, already transposed for out = W @ x.
    w_cat = jnp.concatenate(
        [w_hmap[:, :, 0, 0], w_wh[:, :, 0, 0], w_reg[:, :, 0, 0]],
        axis=0).astype(jnp.float32)                                  # (n_out, C)
    b_cat = jnp.concatenate([b_hmap, b_wh, b_reg]).astype(jnp.float32)  # (n_out,)
    w_cat = jnp.pad(w_cat, ((0, n_pad - n_out), (0, 0)))             # (n_pad, C)
    b_cat = jnp.pad(b_cat, (0, n_pad - n_out))[:, None]              # (n_pad, 1)

    # Big, lane-dense tiles over the pixel axis (kernel is HBM-bound).
    tile_hw = _pick_tile_hw(HW, 4 * (C + n_out), max_tile_bytes, N)
    grid = (N, pl.cdiv(HW, tile_hw))   # both axes parallel (megacore sharding)

    # VMEM budget: double-buffered x + outputs + weights + slack; capped at
    # 40 MiB so it is safe on v7x's 64 MiB/TC while still generous on v5e/v6e.
    x_tile_bytes = C * tile_hw * 4
    out_tile_bytes = n_out * tile_hw * 4
    w_bytes = n_pad * (C + 1) * 4
    vmem_limit = int(min(40 << 20,
                         max(8 << 20,
                             2 * (x_tile_bytes + out_tile_bytes)
                             + 2 * w_bytes + (2 << 20))))

    # Advisory cost: near-zero flops per byte, bandwidth dominated.
    cost = pl.CostEstimate(
        flops=2 * N * HW * C * n_out,
        transcendentals=2 * N * HW,
        bytes_accessed=4 * N * HW * (C + n_out) + 4 * n_pad * (C + 1),
    )

    hmap_flat, wh_flat = pl.pallas_call(
        functools.partial(_head_kernel, num_classes=num_classes),
        out_shape=(jax.ShapeDtypeStruct((N, nc, HW), jnp.float32),
                   jax.ShapeDtypeStruct((N, 4, HW), jnp.float32)),
        grid_spec=pltpu.PrefetchScalarGridSpec(
            num_scalar_prefetch=0,
            grid=grid,
            in_specs=[
                pl.BlockSpec((None, C, tile_hw), lambda n, j: (n, 0, j)),
                pl.BlockSpec((n_pad, C), lambda n, j: (0, 0)),
                pl.BlockSpec((n_pad, 1), lambda n, j: (0, 0)),
            ],
            out_specs=[
                pl.BlockSpec((None, nc, tile_hw), lambda n, j: (n, 0, j)),
                pl.BlockSpec((None, 4, tile_hw), lambda n, j: (n, 0, j)),
            ],
        ),
        compiler_params=pltpu.CompilerParams(
            dimension_semantics=("parallel", "parallel"),
            vmem_limit_bytes=vmem_limit),
        cost_estimate=cost,
    )(x_flat, w_cat, b_cat)

    return {"hmap": hmap_flat.reshape(N, nc, H, W),
            "wh": wh_flat.reshape(N, 4, H, W)}


def _reference(x_nchw, w_hmap, b_hmap, w_wh, b_wh, w_reg, b_reg):
    def conv1x1(x, w, b):  # NCHW 1x1 conv
        return jnp.einsum("nchw,oc->nohw", x, w[:, :, 0, 0]) + b[None, :, None, None]
    hmap = conv1x1(x_nchw, w_hmap, b_hmap)
    wh = jnp.exp(conv1x1(x_nchw, w_wh, b_wh))
    reg = conv1x1(x_nchw, w_reg, b_reg)
    return {"hmap": hmap, "wh": jnp.concatenate([wh, reg], axis=1)}


if __name__ == "__main__":
    key = jax.random.PRNGKey(0)
    N, C, H, W = 2, 4, 16, 16
    num_classes = 1

    k_x, k_w, k_b = jax.random.split(key, 3)
    x = jax.random.normal(k_x, (N, C, H, W), dtype=jnp.float32)

    # Deterministic parameter init matching the module's __init__:
    #   hmap: weight=0, bias=-2.19 ; reg_: weight=0, bias=-2.19
    #   w_h_: default init -> deterministic random draw here.
    w_hmap = jnp.zeros((num_classes, C, 1, 1), jnp.float32)
    b_hmap = jnp.full((num_classes,), -2.19, jnp.float32)
    w_reg = jnp.zeros((2, C, 1, 1), jnp.float32)
    b_reg = jnp.full((2,), -2.19, jnp.float32)
    w_wh = 0.1 * jax.random.normal(k_w, (2, C, 1, 1), dtype=jnp.float32)
    b_wh = 0.1 * jax.random.normal(k_b, (2,), dtype=jnp.float32)

    out = prediction_module_forward(x, w_hmap, b_hmap, w_wh, b_wh, w_reg, b_reg,
                                    num_classes=num_classes)
    jax.block_until_ready(out)

    ref = _reference(x, w_hmap, b_hmap, w_wh, b_wh, w_reg, b_reg)
    assert out["hmap"].shape == (N, num_classes, H, W)
    assert out["wh"].shape == (N, 4, H, W)
    assert jnp.allclose(out["hmap"], ref["hmap"], atol=1e-5)
    assert jnp.allclose(out["wh"], ref["wh"], atol=1e-5)

    print("KERNEL_OK")
</pallas_src>

<mosaic_0001>
module attributes {stable_mosaic.version = 11 : i64} {
  func.func @_head_kernel(%arg0: i32, %arg1: i32, %arg2: memref<1x4x256xf32, #tpu.memory_space<vmem>>, %arg3: memref<8x4xf32, #tpu.memory_space<vmem>>, %arg4: memref<8x1xf32, #tpu.memory_space<vmem>>, %arg5: memref<1x1x256xf32, #tpu.memory_space<vmem>>, %arg6: memref<1x4x256xf32, #tpu.memory_space<vmem>>) attributes {dimension_semantics = [#tpu.dimension_semantics<parallel>, #tpu.dimension_semantics<parallel>], iteration_bounds = array<i64: 2, 1>, scalar_prefetch = 0 : i64, scratch_operands = 0 : i64, tpu.core_type = #tpu.core_type<tc>, window_params = [{transform_indices = @transform_0, window_bounds = array<i64: 1, 4, 256>}, {pipeline_mode = #tpu.pipeline_mode<synchronous>, transform_indices = @transform_1, window_bounds = array<i64: 8, 4>}, {pipeline_mode = #tpu.pipeline_mode<synchronous>, transform_indices = @transform_2, window_bounds = array<i64: 8, 1>}, {transform_indices = @transform_3, window_bounds = array<i64: 1, 1, 256>}, {transform_indices = @transform_4, window_bounds = array<i64: 1, 4, 256>}]} {
    %c0 = arith.constant 0 : index
    %c0_0 = arith.constant 0 : index
    %c0_1 = arith.constant 0 : index
    %0 = vector.load %arg2[%c0, %c0_0, %c0_1] : memref<1x4x256xf32, #tpu.memory_space<vmem>>, vector<1x4x256xf32>
    %1 = vector.shape_cast %0 : vector<1x4x256xf32> to vector<4x256xf32>
    %c0_2 = arith.constant 0 : index
    %c0_3 = arith.constant 0 : index
    %2 = vector.load %arg3[%c0_2, %c0_3] : memref<8x4xf32, #tpu.memory_space<vmem>>, vector<8x4xf32>
    %c0_4 = arith.constant 0 : index
    %c0_5 = arith.constant 0 : index
    %3 = vector.load %arg4[%c0_4, %c0_5] : memref<8x1xf32, #tpu.memory_space<vmem>>, vector<8x1xf32>
    %cst = arith.constant dense<0.000000e+00> : vector<8x256xf32>
    %4 = tpu.matmul %2, %1, %cst {dimension_numbers = #tpu.dot_dimension_numbers<[1], [0], [0], [1], [0, 0, 1, 1], [], []>} : vector<8x4xf32>, vector<4x256xf32>, vector<8x256xf32> -> vector<8x256xf32>
    %5 = vector.broadcast %3 : vector<8x1xf32> to vector<8x256xf32>
    %6 = arith.addf %4, %5 : vector<8x256xf32>
    %7 = vector.extract_strided_slice %6 {offsets = [0, 0], sizes = [1, 256], strides = [1, 1]} : vector<8x256xf32> to vector<1x256xf32>
    %c0_6 = arith.constant 0 : index
    %c0_7 = arith.constant 0 : index
    %c0_8 = arith.constant 0 : index
    %8 = vector.load %arg5[%c0_6, %c0_7, %c0_8] : memref<1x1x256xf32, #tpu.memory_space<vmem>>, vector<1x1x256xf32>
    %9 = vector.shape_cast %8 : vector<1x1x256xf32> to vector<1x256xf32>
    %10 = vector.shape_cast %7 : vector<1x256xf32> to vector<1x1x256xf32>
    tpu.vector_store %arg5[%c0_6, %c0_7, %c0_8], %10 {strides = array<i32>} : memref<1x1x256xf32, #tpu.memory_space<vmem>>, vector<1x1x256xf32>,
    %11 = vector.extract_strided_slice %6 {offsets = [1, 0], sizes = [2, 256], strides = [1, 1]} : vector<8x256xf32> to vector<2x256xf32>
    %12 = math.exp %11 : vector<2x256xf32>
    %c0_9 = arith.constant 0 : index
    %c0_10 = arith.constant 0 : index
    %c0_11 = arith.constant 0 : index
    %13 = vector.load %arg6[%c0_9, %c0_10, %c0_11] : memref<1x4x256xf32, #tpu.memory_space<vmem>>, vector<1x2x256xf32>
    %14 = vector.shape_cast %13 : vector<1x2x256xf32> to vector<2x256xf32>
    %15 = vector.shape_cast %12 : vector<2x256xf32> to vector<1x2x256xf32>
    tpu.vector_store %arg6[%c0_9, %c0_10, %c0_11], %15 {strides = array<i32>} : memref<1x4x256xf32, #tpu.memory_space<vmem>>, vector<1x2x256xf32>,
    %16 = vector.extract_strided_slice %6 {offsets = [3, 0], sizes = [2, 256], strides = [1, 1]} : vector<8x256xf32> to vector<2x256xf32>
    %c0_12 = arith.constant 0 : index
    %c2 = arith.constant 2 : index
    %c0_13 = arith.constant 0 : index
    %17 = vector.load %arg6[%c0_12, %c2, %c0_13] : memref<1x4x256xf32, #tpu.memory_space<vmem>>, vector<1x2x256xf32>
    %18 = vector.shape_cast %17 : vector<1x2x256xf32> to vector<2x256xf32>
    %19 = vector.shape_cast %16 : vector<2x256xf32> to vector<1x2x256xf32>
    tpu.vector_store %arg6[%c0_12, %c2, %c0_13], %19 {strides = array<i32>} : memref<1x4x256xf32, #tpu.memory_space<vmem>>, vector<1x2x256xf32>,
    return
  }
  func.func @transform_0(%arg0: i32, %arg1: i32) -> (i32, i32, i32) {
    %c0_i32 = arith.constant 0 : i32
    %c0_i32_0 = arith.constant 0 : i32
    return %arg0, %c0_i32, %arg1 : i32, i32, i32
  }
  func.func @transform_1(%arg0: i32, %arg1: i32) -> (i32, i32) {
    %c0_i32 = arith.constant 0 : i32
    %c0_i32_0 = arith.constant 0 : i32
    %c0_i32_1 = arith.constant 0 : i32
    return %c0_i32, %c0_i32_0 : i32, i32
  }
  func.func @transform_2(%arg0: i32, %arg1: i32) -> (i32, i32) {
    %c0_i32 = arith.constant 0 : i32
    %c0_i32_0 = arith.constant 0 : i32
    %c0_i32_1 = arith.constant 0 : i32
    return %c0_i32, %c0_i32_0 : i32, i32
  }
  func.func @transform_3(%arg0: i32, %arg1: i32) -> (i32, i32, i32) {
    %c0_i32 = arith.constant 0 : i32
    %c0_i32_0 = arith.constant 0 : i32
    return %arg0, %c0_i32, %arg1 : i32, i32, i32
  }
  func.func @transform_4(%arg0: i32, %arg1: i32) -> (i32, i32, i32) {
    %c0_i32 = arith.constant 0 : i32
    %c0_i32_0 = arith.constant 0 : i32
    return %arg0, %c0_i32, %arg1 : i32, i32, i32
  }
}

</mosaic_0001>

<bundles_post_ra>
// kernel: tpu_custom_call.1
= control target key start
LH: loop header
LB: loop body
LE: loop exit
PB: predicated region body
PF: predicated region fallthrough
CT: control target
= control target key end

     0   :  { %10 = vsyncpa [#allocation3], 0  ;;  %s854_s0 = inlined_call_operand.vmem [shape: f32[2,4,256], index: 0, kind: input, shape index: {}]   ;;  %s855_s1 = inlined_call_operand.vmem [shape: f32[8,4], index: 1, kind: input, shape index: {}]   ;;  %s856_s2 = inlined_call_operand.vmem [shape: f32[8,1], index: 2, kind: input, shape index: {}]   ;;  %s857_s3 = inlined_call_operand.hbm [shape: f32[2,1,256], index: 3, kind: output, shape index: {0}]   ;;  %s858_s4 = inlined_call_operand.hbm [shape: f32[2,4,256], index: 4, kind: output, shape index: {1}]  }
   0x1   :  { %12 = vsyncpa [#allocation3 + $0x1], 0 }
   0x2   :  { %13 = vsyncpa [#allocation5], 0 }
   0x3   :  { %15 = vsyncpa [#allocation5 + $0x1], 0  ;;  %s718_s15 = smov 0   ;;  %s720_s16 = smov 0  }
   0x4   :  { %s722_s17 = smov 0   ;;  %s724_s18 = smov 0  }
   0x5   :  { %s726_s19 = smov 0   ;;  %s728_s20 = smov 0  }
   0x6 LB: > { %s489_s21 = sadd.s32 4294967295, %s690_s20   ;;  %s490_s22 = sadd.s32 4294967294, %s690_s20   ;;  %s690_s20 = sphi %s728_s20, %s21_s20   ;;  %s686_s19 = sphi %s726_s19, %s867_s19   ;;  %s682_s18 = sphi %s724_s18, %s866_s18   ;;  %s678_s17 = sphi %s722_s17, %s865_s17   ;;  %s674_s16 = sphi %s720_s16, %s864_s16   ;;  %s670_s15 = sphi %s718_s15, %s863_s15  }
   0x7   : > { %s33_s23 = sadd.s32 1, %s686_s19  ;;  %s112_s24 = sadd.s32 1, %s678_s17 }
   0x8   : > { %p35_p0 = scmp.ge.s32.totalorder %s33_s23, 2  ;;  %p122_p1 = scmp.ne.s32.totalorder %s678_s17, %s674_s16 }
   0x9   : > { %p123_p2 = scmp.eq.s32.totalorder %s489_s21, 1  ;;  %p128_p3 = scmp.ne.s32.totalorder %s674_s16, %s670_s15 }
   0xa   : > { %s869_s23 = smov (%p35_p0, %s33_s23), 0  ;;  %p129_p5 = scmp.eq.s32.totalorder %s490_s22, 1 }
   0xb   : > { %p758_p4 = por %p123_p2, %p122_p1  ;;  %s107_s26 = ssub.s32 %s686_s19, %s869_s23 }
   0xc   : > { %p493_p6 = scmp.ge.s32.totalorder %s690_s20, 1  ;;  %p110_p7 = scmp.eq.s32.totalorder %s107_s26, 0 }
   0xd   : > { %p765_p8 = por %p129_p5, %p128_p3  ;;  %p194_p9 = scmp.lt.s32.totalorder %s690_s20, 3 }
   0xe   : > { %s771_s28 = scalar_select %p110_p7, %s678_s17, %s112_s24  }
   0xf   : > { %p195_p10 = pnand %p493_p6, %p194_p9 }
  0x10   : > { %p230_p11 = scmp.lt.s32.totalorder (!%p195_p10), %s682_s18, 1  ;;  %s787_s12 = sand.u32 (!%p195_p10), 1, %s674_s16  }
  0x11   : > { %198 = sbr.rel (%p195_p10) target bundleno = 184 (0xb8), region = 32  ;;  %s507_s13 = sshll.u32 (!%p195_p10), %s682_s18, 1 }
  0x12   : > { %s494_s14 = sshll.u32 (!%p195_p10), %s787_s12, 1  ;;  %s356_s24 = scalar_lea.hbm (!%p195_p10), %s857_s3, %s507_s13 }
  0x13   : > { %s221_s26 = scalar_lea.vmem (!%p195_p10), [#allocation2], %s494_s14  ;;  %s360_s30 = sshll.u32 (!%p195_p10), %s356_s24, 4  ;;  %s361_s30 = int_to_ptr.hbm [resolvable:$true] %s360_s30 }
  0x14   : > { %s358_s29 = sshll.u32 (!%p195_p10), %s221_s26, 4  ;;  %s339_s7 = scalar_lea.sflag (!%p195_p10), [#allocation3], %s787_s12  ;;  %s359_s29 = int_to_ptr.vmem [resolvable:$true] %s358_s29 }
  0x15   : > { %s594_s8 = sshra.s32 (!%p195_p10), %s361_s30, 4  ;;  %s600_s13 = scalar_lea.hbm (!%p195_p10), %s857_s3, 4  ;;  %s595_s8 = int_to_ptr.hbm [resolvable:$true] %s594_s8 }
  0x16   : > { %v243_v0 = vld [vmem:[%s856_s2] sm:$0xff]  ;;  %v692_v1 = vmov 0   ;;  %s231_s5 = scalar_select %p230_p11, %s682_s18, 1  ;;  %vm257_vm0 = vcmask 1043456   ;;  %vm253_vm1 = vcmask 31744   ;;  %v308_v7 = vlaneseq }
  0x17   : > { %575 = vset.pattern.permute.xlu0 %v692_v1  ;;  %v242_v3 = vld [vmem:[%s855_s1] sm:$0xff]  ;;  %vm305_vm2 = vcmask 1040384   ;;  %vm329_vm3 = vcmask 1042432   ;;  %vm330_vm4 = vcmask 1046532   ;;  %p601_p1 = scmp.lt.s32.totalorder %s595_s8, %s857_s3 }
  0x18   : > { %246 = vperm.xlu0 %575, %v243_v0   ;;  %s512_s6 = sshll.u32 %s231_s5, 3  ;;  %s495_s5 = sshll.u32 %s787_s12, 3  ;;  %vm310_vm5 = vcmp.lt.s32.totalorder %v308_v7, 256  ;;  %vm797_vm6 = vmor %vm329_vm3, %vm330_vm4 }
  0x19   : > { %s237_s9 = scalar_lea.vmem %s854_s0, %s512_s6  ;;  %s513_s6 = sshll.u32 %s682_s18, 3 }
  0x1a   : > { %v241_v2 = vld [vmem:[%s237_s9] sm:$0xff]  ;;  %s596_s9 = scalar_lea.hbm %s595_s8, 2 }
  0x1b   : > { %250 = vst [vmem:[#allocation1] ss:$2 sm:$0xff] %v241_v2  ;;  %p597_p12 = scmp.ne.s32.totalorder %s595_s8, %s596_s9  ;;  %p602_p2 = scmp.lt.s32.totalorder %s600_s13, %s596_s9 }
  0x1d   : > { %p598_p13 = pnand %p597_p12, %p758_p4  ;;  %p603_p3 = por %p602_p2, %p601_p1 }
  0x1f   : > { %p599_p0 = pneg %p598_p13 }
  0x21   : > { %p604_p5 = pnand %p603_p3, %p599_p0 }
  0x22   : > { %v251_v4 = vld.sshfl [vmem:[#allocation1] sm:$0xff pattern:$0x75316420]  ;;  %v252_v5 = vld.sshfl [vmem:[#allocation1 + $0x8] sm:$0xff pattern:$0x75316420] }
  0x23   : > { %498 = vmatpush.msk.msra.mxu0 %vm257_vm0, %v251_v4  ;;  %500 = vmatpush.msk.msra.mxu1 %vm257_vm0, %v252_v5 }
  0x24   : > { %499 = vmatmul.msk.f32.vlgmr.msra.gmra.mxu0 %vm253_vm1, %v242_v3  ;;  %501 = vmatmul.msk.f32.vlgmr.msra.gmra.mxu1 %vm253_vm1, %v242_v3 }
  0x8a   : > { %v247_v6 = vpop.permute.xlu0 %246 }
  0xa1   : > { %v279_v8 = vpop.f32.mrf.mxu0  ;;  %v299_v9 = vpop.f32.mrf.mxu1 }
  0xa2   : > { %v280_v10 = vadd.f32 %v279_v8, %v247_v6  ;;  %v300_v11 = vadd.f32 %v299_v9, %v247_v6 }
  0xa4   : > { %v304_v12 = vrot.slane %v300_v11, 7  ;;  %v315_v13 = vmul.f32 1.442695, %v300_v11  ;;  %v325_v14 = vrot.slane %v300_v11, 4  ;;  %v313_v15 = vmul.f32 1.442695, %v280_v10 }
  0xa6   : > { %v326_v16 = vsel %vm257_vm0, %v280_v10, %v325_v14  ;;  %v327_v17 = vsel %vm257_vm0, %v325_v14, %v280_v10  ;;  %v306_v18 = vsel %vm305_vm2, %v280_v10, %v304_v12  ;;  %576 = vpow2.f32 %v315_v13 }
  0xa7   : > { %v503_v20 = vrot.slane %v326_v16, 9  ;;  %v504_v21 = vrot.slane %v327_v17, 9  ;;  %312 = vst.msk [vmem:[%s221_s26] sm:$0x3] %vm310_vm5, %v306_v18 }
  0xa8   : > { %607 = shalt.err (!%p604_p5)
}
  0xa9   : > { %514 = dma.vmem_to_hbm [thread:$0]  (%p758_p4), %s359_s29, 32, %s361_s30, %s339_s7   ;;  %578 = vpow2.f32 %v313_v15  ;;  %v335_v22 = vsel %vm797_vm6, %v503_v20, %v504_v21 }
  0xaa   : > { %s228_s18 = scalar_lea.vmem [#allocation4], %s495_s5  ;;  %s373_s26 = scalar_lea.hbm %s858_s4, %s513_s6 }
  0xab   : > { %337 = vst [vmem:[%s228_s18] sm:$0xcc] %v335_v22  ;;  %s375_s8 = sshll.u32 %s228_s18, 4  ;;  %s377_s9 = sshll.u32 %s373_s26, 4  ;;  %s376_s8 = int_to_ptr.vmem [resolvable:$true] %s375_s8  ;;  %s378_s9 = int_to_ptr.hbm [resolvable:$true] %s377_s9 }
  0xac   : > { %v577_v23 = vpop.eup %576  ;;  %s344_s29 = scalar_lea.sflag [#allocation5], %s787_s12  ;;  %s622_s30 = sshra.s32 %s378_s9, 4  ;;  %s623_s30 = int_to_ptr.hbm [resolvable:$true] %s622_s30 }
  0xad   : > { %v319_v24 = vrot.slane %v577_v23, 4  ;;  %s624_s5 = scalar_lea.hbm %s623_s30, 8  ;;  %s628_s10 = scalar_lea.hbm %s858_s4, 16 }
  0xae   : > { %p625_p6 = scmp.ne.s32.totalorder %s623_s30, %s624_s5  ;;  %p629_p10 = scmp.lt.s32.totalorder %s623_s30, %s858_s4 }
  0xaf   : > { %v579_v25 = vpop.eup %578  ;;  %p630_p11 = scmp.lt.s32.totalorder %s628_s10, %s624_s5 }
  0xb0   : > { %v320_v26 = vsel %vm257_vm0, %v579_v25, %v319_v24  ;;  %p626_p7 = pnand %p625_p6, %p758_p4 }
  0xb1   : > { %v502_v27 = vrot.slane %v320_v26, 9  ;;  %p631_p12 = por %p630_p11, %p629_p10 }
  0xb2   : > { %p627_p9 = pneg %p626_p7 }
  0xb3   : > { %324 = vst [vmem:[%s228_s18] sm:$0x33] %v502_v27 }
  0xb4   : > { %p632_p13 = pnand %p631_p12, %p627_p9 }
  0xb6   : > { %635 = shalt.err (!%p632_p13)
}
  0xb7   : > { %515 = dma.vmem_to_hbm [thread:$0]  (%p758_p4), %s376_s8, 128, %s378_s9, %s344_s29  }
  0xb8 PF: > { %p525_p0 = scmp.ge.s32.totalorder %s690_s20, 2  ;;  %s389_s12 = sand.u32 1, %s670_s15  }
  0xb9   : > { %s390_s14 = scalar_lea.sflag [#allocation3], %s389_s12 }
  0xba   : > { %p519_p1 = pnand %p525_p0, %p765_p8 }
  0xbc   : > { %p520_p2 = pneg %p519_p1 }
  0xbe   : > { %661 = dma.done.wait (%p520_p2), %s390_s14, 32  }
  0xbf   : > { %663 = vsyncadd (%p520_p2), %s390_s14, 4294967264  ;;  %s400_s21 = scalar_lea.sflag [#allocation5], %s389_s12 }
  0xc0   : > { %665 = dma.done.wait (%p520_p2), %s400_s21, 128  }
  0xc1   : > { %667 = vsyncadd (%p520_p2), %s400_s21, 4294967168  ;;  %s21_s20 = sadd.s32 1, %s690_s20   ;;  %s863_s15 = smov %s674_s16 }
  0xc2   : > { %p18_p3 = scmp.ge.s32.totalorder %s21_s20, 4   ;;  %s864_s16 = smov %s678_s17 }
  0xc3   : > { %s865_s17 = smov %s771_s28  ;;  %s866_s18 = smov %s686_s19 }
  0xc4   : > { %s867_s19 = smov %s869_s23  ;;  %20 = sbr.rel (!%p18_p3) target bundleno = 6 (0x6), region = 84 }
  0xc9   :  { %406 = vsyncpa [#allocation3], 1 }
  0xca   :  { %408 = vsyncpa [#allocation3 + $0x1], 1 }
  0xcb   :  { %409 = vsyncpa [#allocation5], 1 }
  0xcc   :  { %411 = vsyncpa [#allocation5 + $0x1], 1 }

</bundles_post_ra>
